<compile_context>
chip_gen: v7x
topology: tpu7x:2x2x1
jax: 0.10.0
libtpu: 0.0.40
codegen_flags: <defaults>
</compile_context>

<pallas_src>
import jax
import jax.numpy as jnp
from jax.experimental import pallas as pl
from jax.experimental.pallas import tpu as pltpu


# ----------------------------------------------------------------------------
# Tiling helpers
# ----------------------------------------------------------------------------
_ROW_TILE = 1024          # row tile for large dims (multiple of 128 -> lane-aligned gid blocks)
_GROUP_TILE = 256         # segment-sum accumulator window (groups per output block)
_VMEM_LIMIT_BYTES = 32 * 1024 * 1024   # explicit budget; fits v7x's 64 MiB physical VMEM


def _round_up(x, m):
    return ((x + m - 1) // m) * m


def _dims(n):
    """(padded size, row tile, group window) for a row/group dimension of size n."""
    if n <= _ROW_TILE:
        p = _round_up(max(n, 8), 8)
        return p, p, p                      # single tile / single window
    p = _round_up(n, _ROW_TILE)
    return p, _ROW_TILE, _GROUP_TILE        # _GROUP_TILE divides _ROW_TILE


# ----------------------------------------------------------------------------
# Work-item schedule for the windowed segment sum over SORTED group ids
# ----------------------------------------------------------------------------
def _build_work_items(gid_row, rows_pad, row_tile, groups_pad, group_tile):
    """One work item = (output group block, input row tile).

    Rows are sorted by group id, so each group block touches a contiguous range of
    row tiles; the number of (block, tile) incidences is bounded by
    num_row_tiles + num_blocks - 1 (static), which is used as the grid size and
    padded with no-op items (valid=0).  Padded rows carry the sentinel group id
    `groups_pad`, which lies outside every window [b*gt, (b+1)*gt) so they never
    contribute."""
    num_row_tiles = rows_pad // row_tile
    num_blocks = groups_pad // group_tile
    n_items = num_row_tiles + num_blocks - 1

    b = jnp.arange(num_blocks, dtype=jnp.int32)
    row_start = jnp.searchsorted(gid_row, b * group_tile, side="left").astype(jnp.int32)
    row_end = jnp.searchsorted(gid_row, (b + 1) * group_tile, side="left").astype(jnp.int32)
    tile_lo = row_start // row_tile
    tile_hi = jnp.where(row_end > row_start,
                        (row_end + row_tile - 1) // row_tile,
                        tile_lo + 1)                         # empty block -> one no-op item
    n_tiles = (tile_hi - tile_lo).astype(jnp.int32)          # >= 1 per block
    cum = jnp.concatenate([jnp.zeros((1,), jnp.int32),
                           jnp.cumsum(n_tiles).astype(jnp.int32)])
    total = cum[-1]

    w = jnp.arange(n_items, dtype=jnp.int32)
    blk = jnp.clip(jnp.searchsorted(cum, w, side="right").astype(jnp.int32) - 1,
                   0, num_blocks - 1)
    tile = jnp.clip(tile_lo[blk] + (w - cum[blk]), 0, num_row_tiles - 1).astype(jnp.int32)
    valid = (w < total).astype(jnp.int32)
    return tile, blk, valid, n_items


# ----------------------------------------------------------------------------
# Fused kernel: [concat ->] Linear -> [folded BN] -> ReLU -> Linear [-> windowed segsum]
# ----------------------------------------------------------------------------
def _make_kernel(n_x, widths, has_mlp, has_scalar, segsum):
    use_xcat = has_mlp and n_x > 1

    def kernel(*refs):
        i = 0
        if segsum:
            wt_ref, wg_ref, wv_ref = refs[0], refs[1], refs[2]     # scalar prefetch (SMEM)
            i = 3
        x_refs = refs[i:i + n_x]; i += n_x
        s_ref = None
        if has_scalar:
            s_ref = refs[i]; i += 1
        gid_ref = None
        if segsum:
            gid_ref = refs[i]; i += 1
        if has_mlp:
            w1x_ref = refs[i]; i += 1
            w1s_ref = None
            if has_scalar:
                w1s_ref = refs[i]; i += 1
            b1_ref = refs[i]; i += 1
            w2_ref = refs[i]; i += 1
            b2_ref = refs[i]; i += 1
        o_ref = refs[i]; i += 1
        xcat_ref = None
        if use_xcat:
            xcat_ref = refs[i]; i += 1
        acc_ref = refs[i] if segsum else None

        # ---- 2-layer MLP (inference BN folded into W1/b1), f32 accumulation ----
        if has_mlp:
            if use_xcat:
                off = 0
                for xr, wdt in zip(x_refs, widths):       # lane-aligned offsets (0, 128, ...)
                    xcat_ref[:, off:off + wdt] = xr[...].astype(jnp.bfloat16)
                    off += wdt
                xin = xcat_ref[...]
            else:
                xin = x_refs[0][...].astype(jnp.bfloat16)
            h = jnp.dot(xin, w1x_ref[...], preferred_element_type=jnp.float32)
            if has_scalar:
                h += s_ref[...] * w1s_ref[...]            # rank-1 scalar-column contribution
            h = jnp.maximum(h + b1_ref[...], 0.0)
            y = jnp.dot(h.astype(jnp.bfloat16), w2_ref[...],
                        preferred_element_type=jnp.float32) + b2_ref[...]
        else:
            y = x_refs[0][...].astype(jnp.float32)

        if segsum:
            w_id = pl.program_id(0)
            blk = wg_ref[w_id]
            prev_blk = wg_ref[jnp.maximum(w_id - 1, 0)]

            @pl.when(jnp.logical_or(w_id == 0, blk != prev_blk))
            def _():
                acc_ref[...] = jnp.zeros_like(acc_ref)    # fresh group window

            @pl.when(wv_ref[w_id] == 1)
            def _():
                gt = acc_ref.shape[0]
                # windowed one-hot: only `gt` groups, never the full group count.
                rel = gid_ref[...] - blk * gt             # (1, row_tile) int32
                onehot = (jax.lax.broadcasted_iota(jnp.int32, (gt, rel.shape[-1]), 0)
                          == rel).astype(jnp.float32)
                acc_ref[...] += jnp.dot(onehot, y, preferred_element_type=jnp.float32)

            # output block stays resident while the group window is unchanged; whatever
            # is written last before the window advances is flushed to HBM.
            o_ref[...] = acc_ref[...].astype(o_ref.dtype)
        else:
            o_ref[...] = y.astype(o_ref.dtype)

    return kernel


def _fused_stage(x_list, params, *, row_tile, scalar_col=None, seg=None,
                 out_dtype=jnp.float32):
    """One pallas_call: fused 2-layer MLP (params=None -> identity), optionally
    followed by a group-windowed segment sum (seg = dict(gid, groups_pad, group_tile))."""
    n_x = len(x_list)
    widths = [int(x.shape[1]) for x in x_list]
    rows = x_list[0].shape[0]
    assert rows % row_tile == 0
    has_mlp = params is not None
    has_scalar = scalar_col is not None
    segsum = seg is not None
    out_width = params["w2"].shape[1] if has_mlp else widths[0]

    if segsum:
        row_map = lambda w, wt, wg, wv: (wt[w], 0)
        gid_map = lambda w, wt, wg, wv: (0, wt[w])
        const_map = lambda w, wt, wg, wv: (0, 0)
    else:
        row_map = lambda i: (i, 0)
        const_map = lambda i: (0, 0)

    operands, in_specs = [], []
    for x in x_list:
        operands.append(x)
        in_specs.append(pl.BlockSpec((row_tile, x.shape[1]), row_map))
    if has_scalar:
        operands.append(scalar_col)                                   # (rows, 1) f32
        in_specs.append(pl.BlockSpec((row_tile, 1), row_map))
    if segsum:
        operands.append(seg["gid"])                                   # (1, rows) int32
        in_specs.append(pl.BlockSpec((1, row_tile), gid_map))
    if has_mlp:
        operands.append(params["w1x"])
        in_specs.append(pl.BlockSpec(params["w1x"].shape, const_map))
        if has_scalar:
            operands.append(params["w1s"])
            in_specs.append(pl.BlockSpec(params["w1s"].shape, const_map))
        operands += [params["b1"], params["w2"], params["b2"]]
        in_specs += [pl.BlockSpec(params["b1"].shape, const_map),
                     pl.BlockSpec(params["w2"].shape, const_map),
                     pl.BlockSpec(params["b2"].shape, const_map)]

    scratch = []
    if has_mlp and n_x > 1:
        scratch.append(pltpu.VMEM((row_tile, sum(widths)), jnp.bfloat16))   # in-kernel concat

    kernel = _make_kernel(n_x, widths, has_mlp, has_scalar, segsum)

    if segsum:
        groups_pad, gt = seg["groups_pad"], seg["group_tile"]
        wt, wg, wv, n_items = _build_work_items(seg["gid"][0], rows, row_tile,
                                                groups_pad, gt)
        scratch.append(pltpu.VMEM((gt, out_width), jnp.float32))            # windowed acc
        out_shape = jax.ShapeDtypeStruct((groups_pad, out_width), out_dtype)
        out_specs = pl.BlockSpec((gt, out_width), lambda w, wt_, wg_, wv_: (wg_[w], 0))
        grid_spec = pltpu.PrefetchScalarGridSpec(
            num_scalar_prefetch=3, grid=(n_items,),
            in_specs=in_specs, out_specs=out_specs, scratch_shapes=scratch)
        semantics = ("arbitrary",)          # accumulator revisits the same output window
        call_args = [wt, wg, wv] + operands
    else:
        out_shape = jax.ShapeDtypeStruct((rows, out_width), out_dtype)
        out_specs = pl.BlockSpec((row_tile, out_width), row_map)
        grid_spec = pltpu.PrefetchScalarGridSpec(
            num_scalar_prefetch=0, grid=(rows // row_tile,),
            in_specs=in_specs, out_specs=out_specs, scratch_shapes=scratch)
        semantics = ("parallel",)
        call_args = operands

    return pl.pallas_call(
        kernel,
        out_shape=out_shape,
        grid_spec=grid_spec,
        compiler_params=pltpu.CompilerParams(
            dimension_semantics=semantics,
            vmem_limit_bytes=_VMEM_LIMIT_BYTES),
    )(*call_args)


# ----------------------------------------------------------------------------
# Parameter construction (deterministic, synthetic): BN folded, W1 stacked for the
# in-kernel concat layout, hidden/output widths zero-padded to multiples of 128.
# ----------------------------------------------------------------------------
def make_mlp_params(key, sem_widths, layout_widths, n_scalar, hid, out_dim, batch_norm):
    hid_pad = _round_up(hid, 128)
    out_pad = _round_up(out_dim, 128)
    k_sem = sum(sem_widths) + n_scalar
    k1, k2, k3, k4 = jax.random.split(key, 4)
    w1 = jax.random.normal(k1, (k_sem, hid), jnp.float32) / jnp.sqrt(jnp.float32(k_sem))
    b1 = 0.01 * jax.random.normal(k2, (1, hid), jnp.float32)
    w2 = jax.random.normal(k3, (hid, out_dim), jnp.float32) / jnp.sqrt(jnp.float32(hid))
    b2 = 0.01 * jax.random.normal(k4, (1, out_dim), jnp.float32)
    if batch_norm:
        # inference BatchNorm1d folded:  (x@W1+b1)*scale+shift == x@(W1*scale)+(b1*scale+shift)
        eps = 1e-5
        gamma = jnp.ones((1, hid), jnp.float32)
        beta = jnp.zeros((1, hid), jnp.float32)
        run_mean = jnp.zeros((1, hid), jnp.float32)
        run_var = jnp.ones((1, hid), jnp.float32)
        scale = gamma / jnp.sqrt(run_var + eps)
        shift = beta - run_mean * scale
        w1 = w1 * scale
        b1 = b1 * scale + shift

    # Stack the per-input W1 row blocks at their kernel-layout offsets; rows facing
    # zero-padded input columns stay zero.
    k_layout = sum(layout_widths)
    w1x = jnp.zeros((k_layout, hid_pad), jnp.float32)
    so = lo = 0
    for sw, lw in zip(sem_widths, layout_widths):
        w1x = w1x.at[lo:lo + sw, :hid].set(w1[so:so + sw])
        so += sw
        lo += lw
    w1s = None
    if n_scalar:
        w1s = jnp.zeros((1, hid_pad), jnp.float32).at[:, :hid].set(w1[so:so + 1])
    b1p = jnp.zeros((1, hid_pad), jnp.float32).at[:, :hid].set(b1)
    w2p = jnp.zeros((hid_pad, out_pad), jnp.float32).at[:hid, :out_dim].set(w2)
    b2p = jnp.zeros((1, out_pad), jnp.float32).at[:, :out_dim].set(b2)
    return {"w1x": w1x.astype(jnp.bfloat16), "w1s": w1s, "b1": b1p,
            "w2": w2p.astype(jnp.bfloat16), "b2": b2p}


def make_gd_transform_params(key, emb_dim, gd_deg=True, batch_norm=True):
    out_pad = _round_up(emb_dim, 128)
    k1, k2, k3 = jax.random.split(key, 3)
    params = {}
    if gd_deg:
        params["mlp_gd_deg"] = make_mlp_params(
            k1, sem_widths=[emb_dim], layout_widths=[emb_dim], n_scalar=1,
            hid=2 * emb_dim, out_dim=emb_dim, batch_norm=False)
    params["mlp_nei_gd"] = make_mlp_params(
        k2, sem_widths=[emb_dim, emb_dim], layout_widths=[out_pad, emb_dim], n_scalar=1,
        hid=4 * emb_dim, out_dim=emb_dim, batch_norm=batch_norm)
    params["mlp_node_nei"] = make_mlp_params(
        k3, sem_widths=[emb_dim, emb_dim], layout_widths=[out_pad, emb_dim], n_scalar=0,
        hid=4 * emb_dim, out_dim=emb_dim, batch_norm=batch_norm)
    return params


def count_to_group_index(count, total):
    return jnp.repeat(jnp.arange(count.shape[0], dtype=jnp.int32), count,
                      total_repeat_length=total)


# ----------------------------------------------------------------------------
# GDTransform.forward
# ----------------------------------------------------------------------------
def gd_transform_forward(params, repr_, nodes, neighbors, neighbor_count, dist,
                         gd, gd_count, gd_deg, *, use_gd_deg=True):
    d = repr_.shape[1]
    M = nodes.shape[0]
    E = neighbors.shape[0]
    G = gd.shape[0]
    out_pad = _round_up(d, 128)

    G_pad, tile_g, _ = _dims(G)
    E_pad, tile_e, gt_e = _dims(E)
    M_pad, tile_m, gt_m = _dims(M)

    repr_bf = repr_.astype(jnp.bfloat16)   # single cast; halves gather + matmul traffic

    def pad1(a, n, value=0):
        return jnp.pad(a, (0, n - a.shape[0]), constant_values=value)

    # gathers produce already row-padded activations (padded indices point at row 0)
    gd_repr = repr_bf[pad1(gd, G_pad)]                    # (G_pad, d)
    neighbors_repr = repr_bf[pad1(neighbors, E_pad)]      # (E_pad, d)
    nodes_repr = repr_bf[pad1(nodes, M_pad)]              # (M_pad, d)

    gd_deg_col = pad1(gd_deg.astype(jnp.float32), G_pad).reshape(G_pad, 1)
    dist_col = pad1(dist.astype(jnp.float32), E_pad).reshape(E_pad, 1)

    # sorted/contiguous group indices; padded rows get the out-of-window sentinel
    # (= padded group count), which lies outside every group window.
    gd_group = pad1(count_to_group_index(gd_count, G), G_pad, value=E_pad).reshape(1, G_pad)
    nei_group = pad1(count_to_group_index(neighbor_count, E), E_pad, value=M_pad).reshape(1, E_pad)

    # stage 1: MLP(gd_repr ++ gd_deg) fused with windowed scatter-sum over gd_count groups
    if use_gd_deg:
        seg1 = _fused_stage([gd_repr], params["mlp_gd_deg"], row_tile=tile_g,
                            scalar_col=gd_deg_col,
                            seg=dict(gid=gd_group, groups_pad=E_pad, group_tile=gt_e),
                            out_dtype=jnp.float32)                         # (E_pad, out_pad)
    else:
        seg1 = _fused_stage([gd_repr], None, row_tile=tile_g,
                            seg=dict(gid=gd_group, groups_pad=E_pad, group_tile=gt_e),
                            out_dtype=jnp.float32)                         # (E_pad, d)
        seg1 = jnp.pad(seg1, ((0, 0), (0, out_pad - seg1.shape[1])))       # lane-dense layout

    # stage 2: MLP(seg1 ++ neighbors_repr ++ dist) fused with windowed scatter-sum
    seg2 = _fused_stage([seg1, neighbors_repr], params["mlp_nei_gd"], row_tile=tile_e,
                        scalar_col=dist_col,
                        seg=dict(gid=nei_group, groups_pad=M_pad, group_tile=gt_m),
                        out_dtype=jnp.float32)                              # (M_pad, out_pad)

    # stage 3: MLP(seg2 ++ repr[nodes])
    node_repr = _fused_stage([seg2, nodes_repr], params["mlp_node_nei"], row_tile=tile_m,
                             out_dtype=jnp.float32)                         # (M_pad, out_pad)
    return node_repr[:M, :d]


# ----------------------------------------------------------------------------
if __name__ == "__main__":
    key = jax.random.PRNGKey(0)
    k_par, k_repr, k_nb, k_dist, k_gdc, k_gd, k_deg, k_nodes = jax.random.split(key, 8)

    emb_dim = 32          # d
    num_nodes_total = 64  # N (rows of repr)
    M = 8                 # nodes of interest

    params = make_gd_transform_params(k_par, emb_dim, gd_deg=True, batch_norm=True)

    repr_ = jax.random.normal(k_repr, (num_nodes_total, emb_dim), jnp.float32)
    nodes = jax.random.randint(k_nodes, (M,), 0, num_nodes_total, jnp.int32)

    neighbor_count = jnp.array([2, 3, 1, 2, 4, 2, 3, 3], jnp.int32)        # per node
    E = int(neighbor_count.sum())                                          # 20 neighbors
    neighbors = jax.random.randint(k_nb, (E,), 0, num_nodes_total, jnp.int32)
    dist = jax.random.uniform(k_dist, (E,), jnp.float32, 1.0, 4.0)

    gd_count = jax.random.randint(k_gdc, (E,), 1, 4, jnp.int32)            # per neighbor
    G = int(gd_count.sum())
    gd = jax.random.randint(k_gd, (G,), 0, num_nodes_total, jnp.int32)
    gd_deg = jax.random.uniform(k_deg, (G,), jnp.float32, 1.0, 5.0)

    out = gd_transform_forward(params, repr_, nodes, neighbors, neighbor_count,
                               dist, gd, gd_count, gd_deg, use_gd_deg=True)
    out = jax.block_until_ready(out)
    assert out.shape == (M, emb_dim), out.shape
    assert bool(jnp.all(jnp.isfinite(out)))
    print("KERNEL_OK")
</pallas_src>

<mosaic_0001>
module attributes {stable_mosaic.version = 11 : i64} {
  func.func @kernel(%arg0: i32, %arg1: memref<1xi32, #tpu.memory_space<smem>>, %arg2: memref<1xi32, #tpu.memory_space<smem>>, %arg3: memref<1xi32, #tpu.memory_space<smem>>, %arg4: memref<40x32xbf16, #tpu.memory_space<vmem>>, %arg5: memref<40x1xf32, #tpu.memory_space<vmem>>, %arg6: memref<1x40xi32, #tpu.memory_space<vmem>>, %arg7: memref<32x128xbf16, #tpu.memory_space<vmem>>, %arg8: memref<1x128xf32, #tpu.memory_space<vmem>>, %arg9: memref<1x128xf32, #tpu.memory_space<vmem>>, %arg10: memref<128x128xbf16, #tpu.memory_space<vmem>>, %arg11: memref<1x128xf32, #tpu.memory_space<vmem>>, %arg12: memref<24x128xf32, #tpu.memory_space<vmem>>, %arg13: memref<24x128xf32, #tpu.memory_space<vmem>>) attributes {dimension_semantics = [#tpu.dimension_semantics<arbitrary>], iteration_bounds = array<i64: 1>, scalar_prefetch = 3 : i64, scratch_operands = 1 : i64, tpu.core_type = #tpu.core_type<tc>, window_params = [{transform_indices = @transform_0, window_bounds = array<i64: 40, 32>}, {transform_indices = @transform_1, window_bounds = array<i64: 40, 1>}, {transform_indices = @transform_2, window_bounds = array<i64: 1, 40>}, {pipeline_mode = #tpu.pipeline_mode<synchronous>, transform_indices = @transform_3, window_bounds = array<i64: 32, 128>}, {pipeline_mode = #tpu.pipeline_mode<synchronous>, transform_indices = @transform_4, window_bounds = array<i64: 1, 128>}, {pipeline_mode = #tpu.pipeline_mode<synchronous>, transform_indices = @transform_5, window_bounds = array<i64: 1, 128>}, {pipeline_mode = #tpu.pipeline_mode<synchronous>, transform_indices = @transform_6, window_bounds = array<i64: 128, 128>}, {pipeline_mode = #tpu.pipeline_mode<synchronous>, transform_indices = @transform_7, window_bounds = array<i64: 1, 128>}, {transform_indices = @transform_8, window_bounds = array<i64: 24, 128>}]} {
    %c0 = arith.constant 0 : index
    %c0_0 = arith.constant 0 : index
    %0 = vector.load %arg4[%c0, %c0_0] : memref<40x32xbf16, #tpu.memory_space<vmem>>, vector<40x32xbf16>
    %c0_1 = arith.constant 0 : index
    %c0_2 = arith.constant 0 : index
    %1 = vector.load %arg7[%c0_1, %c0_2] : memref<32x128xbf16, #tpu.memory_space<vmem>>, vector<32x128xbf16>
    %cst = arith.constant dense<0.000000e+00> : vector<40x128xf32>
    %2 = tpu.matmul %0, %1, %cst {dimension_numbers = #tpu.dot_dimension_numbers<[1], [0], [0], [1], [0, 0, 1, 1], [], []>} : vector<40x32xbf16>, vector<32x128xbf16>, vector<40x128xf32> -> vector<40x128xf32>
    %c0_3 = arith.constant 0 : index
    %c0_4 = arith.constant 0 : index
    %3 = vector.load %arg5[%c0_3, %c0_4] : memref<40x1xf32, #tpu.memory_space<vmem>>, vector<40x1xf32>
    %c0_5 = arith.constant 0 : index
    %c0_6 = arith.constant 0 : index
    %4 = vector.load %arg8[%c0_5, %c0_6] : memref<1x128xf32, #tpu.memory_space<vmem>>, vector<1x128xf32>
    %5 = vector.broadcast %3 : vector<40x1xf32> to vector<40x128xf32>
    %6 = vector.broadcast %4 : vector<1x128xf32> to vector<40x128xf32>
    %7 = arith.mulf %5, %6 : vector<40x128xf32>
    %8 = arith.addf %2, %7 : vector<40x128xf32>
    %c0_7 = arith.constant 0 : index
    %c0_8 = arith.constant 0 : index
    %9 = vector.load %arg9[%c0_7, %c0_8] : memref<1x128xf32, #tpu.memory_space<vmem>>, vector<1x128xf32>
    %10 = vector.broadcast %9 : vector<1x128xf32> to vector<40x128xf32>
    %11 = arith.addf %8, %10 : vector<40x128xf32>
    %cst_9 = arith.constant 0.000000e+00 : f32
    %12 = vector.broadcast %cst_9 : f32 to vector<40x128xf32>
    %13 = arith.maximumf %11, %12 : vector<40x128xf32>
    %14 = arith.truncf %13 : vector<40x128xf32> to vector<40x128xbf16>
    %c0_10 = arith.constant 0 : index
    %c0_11 = arith.constant 0 : index
    %15 = vector.load %arg10[%c0_10, %c0_11] : memref<128x128xbf16, #tpu.memory_space<vmem>>, vector<128x128xbf16>
    %cst_12 = arith.constant dense<0.000000e+00> : vector<40x128xf32>
    %16 = tpu.matmul %14, %15, %cst_12 {dimension_numbers = #tpu.dot_dimension_numbers<[1], [0], [0], [1], [0, 0, 1, 1], [], []>} : vector<40x128xbf16>, vector<128x128xbf16>, vector<40x128xf32> -> vector<40x128xf32>
    %c0_13 = arith.constant 0 : index
    %c0_14 = arith.constant 0 : index
    %17 = vector.load %arg11[%c0_13, %c0_14] : memref<1x128xf32, #tpu.memory_space<vmem>>, vector<1x128xf32>
    %18 = vector.broadcast %17 : vector<1x128xf32> to vector<40x128xf32>
    %19 = arith.addf %16, %18 : vector<40x128xf32>
    %20 = arith.index_cast %arg0 : i32 to index
    %21 = memref.load %arg2[%20] : memref<1xi32, #tpu.memory_space<smem>>
    %c1_i32 = arith.constant 1 : i32
    %22 = arith.subi %arg0, %c1_i32 : i32
    %c0_i32 = arith.constant 0 : i32
    %23 = arith.maxsi %22, %c0_i32 : i32
    %24 = arith.index_cast %23 : i32 to index
    %25 = memref.load %arg2[%24] : memref<1xi32, #tpu.memory_space<smem>>
    %c0_i32_15 = arith.constant 0 : i32
    %26 = arith.cmpi eq, %arg0, %c0_i32_15 : i32
    %27 = arith.cmpi ne, %21, %25 : i32
    %28 = arith.ori %26, %27 : i1
    %29 = arith.extui %28 : i1 to i32
    %c0_i32_16 = arith.constant 0 : i32
    %30 = arith.cmpi ne, %29, %c0_i32_16 : i32
    scf.if %30 {
      %cst_23 = arith.constant 0.000000e+00 : f32
      %38 = vector.broadcast %cst_23 : f32 to vector<24x128xf32>
      %c0_24 = arith.constant 0 : index
      %c0_25 = arith.constant 0 : index
      %39 = vector.load %arg13[%c0_24, %c0_25] : memref<24x128xf32, #tpu.memory_space<vmem>>, vector<24x128xf32>
      tpu.vector_store %arg13[%c0_24, %c0_25], %38 {strides = array<i32>} : memref<24x128xf32, #tpu.memory_space<vmem>>, vector<24x128xf32>,
    } else {
    }
    %31 = arith.index_cast %arg0 : i32 to index
    %32 = memref.load %arg3[%31] : memref<1xi32, #tpu.memory_space<smem>>
    %c1_i32_17 = arith.constant 1 : i32
    %33 = arith.cmpi eq, %32, %c1_i32_17 : i32
    %34 = arith.extui %33 : i1 to i32
    %c0_i32_18 = arith.constant 0 : i32
    %35 = arith.cmpi ne, %34, %c0_i32_18 : i32
    scf.if %35 {
      %c0_23 = arith.constant 0 : index
      %c0_24 = arith.constant 0 : index
      %38 = vector.load %arg6[%c0_23, %c0_24] : memref<1x40xi32, #tpu.memory_space<vmem>>, vector<1x40xi32>
      %c24_i32 = arith.constant 24 : i32
      %39 = arith.muli %21, %c24_i32 : i32
      %40 = vector.broadcast %39 : i32 to vector<1x40xi32>
      %41 = arith.subi %38, %40 : vector<1x40xi32>
      %42 = tpu.iota {dimensions = array<i32: 0>} : vector<24x40xi32>
      %43 = vector.broadcast %41 : vector<1x40xi32> to vector<24x40xi32>
      %44 = arith.cmpi eq, %42, %43 : vector<24x40xi32>
      %45 = arith.extui %44 : vector<24x40xi1> to vector<24x40xi32>
      %46 = arith.sitofp %45 : vector<24x40xi32> to vector<24x40xf32>
      %c0_25 = arith.constant 0 : index
      %c0_26 = arith.constant 0 : index
      %47 = vector.load %arg13[%c0_25, %c0_26] : memref<24x128xf32, #tpu.memory_space<vmem>>, vector<24x128xf32>
      %cst_27 = arith.constant dense<0.000000e+00> : vector<24x128xf32>
      %48 = tpu.matmul %46, %19, %cst_27 {dimension_numbers = #tpu.dot_dimension_numbers<[1], [0], [0], [1], [0, 0, 1, 1], [], []>} : vector<24x40xf32>, vector<40x128xf32>, vector<24x128xf32> -> vector<24x128xf32>
      %49 = arith.addf %47, %48 : vector<24x128xf32>
      %c0_28 = arith.constant 0 : index
      %c0_29 = arith.constant 0 : index
      %50 = vector.load %arg13[%c0_28, %c0_29] : memref<24x128xf32, #tpu.memory_space<vmem>>, vector<24x128xf32>
      tpu.vector_store %arg13[%c0_28, %c0_29], %49 {strides = array<i32>} : memref<24x128xf32, #tpu.memory_space<vmem>>, vector<24x128xf32>,
    } else {
    }
    %c0_19 = arith.constant 0 : index
    %c0_20 = arith.constant 0 : index
    %36 = vector.load %arg13[%c0_19, %c0_20] : memref<24x128xf32, #tpu.memory_space<vmem>>, vector<24x128xf32>
    %c0_21 = arith.constant 0 : index
    %c0_22 = arith.constant 0 : index
    %37 = vector.load %arg12[%c0_21, %c0_22] : memref<24x128xf32, #tpu.memory_space<vmem>>, vector<24x128xf32>
    tpu.vector_store %arg12[%c0_21, %c0_22], %36 {strides = array<i32>} : memref<24x128xf32, #tpu.memory_space<vmem>>, vector<24x128xf32>,
    return
  }
  func.func @transform_0(%arg0: i32, %arg1: memref<1xi32, #tpu.memory_space<smem>>, %arg2: memref<1xi32, #tpu.memory_space<smem>>, %arg3: memref<1xi32, #tpu.memory_space<smem>>) -> (i32, i32) {
    %0 = arith.index_cast %arg0 : i32 to index
    %1 = memref.load %arg1[%0] : memref<1xi32, #tpu.memory_space<smem>>
    %c0_i32 = arith.constant 0 : i32
    %c0_i32_0 = arith.constant 0 : i32
    return %1, %c0_i32 : i32, i32
  }
  func.func @transform_1(%arg0: i32, %arg1: memref<1xi32, #tpu.memory_space<smem>>, %arg2: memref<1xi32, #tpu.memory_space<smem>>, %arg3: memref<1xi32, #tpu.memory_space<smem>>) -> (i32, i32) {
    %0 = arith.index_cast %arg0 : i32 to index
    %1 = memref.load %arg1[%0] : memref<1xi32, #tpu.memory_space<smem>>
    %c0_i32 = arith.constant 0 : i32
    %c0_i32_0 = arith.constant 0 : i32
    return %1, %c0_i32 : i32, i32
  }
  func.func @transform_2(%arg0: i32, %arg1: memref<1xi32, #tpu.memory_space<smem>>, %arg2: memref<1xi32, #tpu.memory_space<smem>>, %arg3: memref<1xi32, #tpu.memory_space<smem>>) -> (i32, i32) {
    %0 = arith.index_cast %arg0 : i32 to index
    %1 = memref.load %arg1[%0] : memref<1xi32, #tpu.memory_space<smem>>
    %c0_i32 = arith.constant 0 : i32
    %c0_i32_0 = arith.constant 0 : i32
    return %c0_i32, %1 : i32, i32
  }
  func.func @transform_3(%arg0: i32, %arg1: memref<1xi32, #tpu.memory_space<smem>>, %arg2: memref<1xi32, #tpu.memory_space<smem>>, %arg3: memref<1xi32, #tpu.memory_space<smem>>) -> (i32, i32) {
    %c0_i32 = arith.constant 0 : i32
    %c0_i32_0 = arith.constant 0 : i32
    %c0_i32_1 = arith.constant 0 : i32
    return %c0_i32, %c0_i32_0 : i32, i32
  }
  func.func @transform_4(%arg0: i32, %arg1: memref<1xi32, #tpu.memory_space<smem>>, %arg2: memref<1xi32, #tpu.memory_space<smem>>, %arg3: memref<1xi32, #tpu.memory_space<smem>>) -> (i32, i32) {
    %c0_i32 = arith.constant 0 : i32
    %c0_i32_0 = arith.constant 0 : i32
    %c0_i32_1 = arith.constant 0 : i32
    return %c0_i32, %c0_i32_0 : i32, i32
  }
  func.func @transform_5(%arg0: i32, %arg1: memref<1xi32, #tpu.memory_space<smem>>, %arg2: memref<1xi32, #tpu.memory_space<smem>>, %arg3: memref<1xi32, #tpu.memory_space<smem>>) -> (i32, i32) {
    %c0_i32 = arith.constant 0 : i32
    %c0_i32_0 = arith.constant 0 : i32
    %c0_i32_1 = arith.constant 0 : i32
    return %c0_i32, %c0_i32_0 : i32, i32
  }
  func.func @transform_6(%arg0: i32, %arg1: memref<1xi32, #tpu.memory_space<smem>>, %arg2: memref<1xi32, #tpu.memory_space<smem>>, %arg3: memref<1xi32, #tpu.memory_space<smem>>) -> (i32, i32) {
    %c0_i32 = arith.constant 0 : i32
    %c0_i32_0 = arith.constant 0 : i32
    %c0_i32_1 = arith.constant 0 : i32
    return %c0_i32, %c0_i32_0 : i32, i32
  }
  func.func @transform_7(%arg0: i32, %arg1: memref<1xi32, #tpu.memory_space<smem>>, %arg2: memref<1xi32, #tpu.memory_space<smem>>, %arg3: memref<1xi32, #tpu.memory_space<smem>>) -> (i32, i32) {
    %c0_i32 = arith.constant 0 : i32
    %c0_i32_0 = arith.constant 0 : i32
    %c0_i32_1 = arith.constant 0 : i32
    return %c0_i32, %c0_i32_0 : i32, i32
  }
  func.func @transform_8(%arg0: i32, %arg1: memref<1xi32, #tpu.memory_space<smem>>, %arg2: memref<1xi32, #tpu.memory_space<smem>>, %arg3: memref<1xi32, #tpu.memory_space<smem>>) -> (i32, i32) {
    %0 = arith.index_cast %arg0 : i32 to index
    %1 = memref.load %arg2[%0] : memref<1xi32, #tpu.memory_space<smem>>
    %c0_i32 = arith.constant 0 : i32
    %c0_i32_0 = arith.constant 0 : i32
    return %1, %c0_i32 : i32, i32
  }
}

</mosaic_0001>

<bundles_post_ra>
// kernel: tpu_custom_call.1
= control target key start
LH: loop header
LB: loop body
LE: loop exit
PB: predicated region body
PF: predicated region fallthrough
CT: control target
= control target key end

     0   :  { %s959_s0 = inlined_call_operand.<no memory space> [shape: s32[1], index: 0, kind: input, shape index: {}]   ;;  %s960_s1 = inlined_call_operand.<no memory space> [shape: s32[1], index: 1, kind: input, shape index: {}]   ;;  %s961_s2 = inlined_call_operand.<no memory space> [shape: s32[1], index: 2, kind: input, shape index: {}]   ;;  %s962_s3 = inlined_call_operand.vmem [shape: bf16[40,32], index: 3, kind: input, shape index: {}]   ;;  %s963_s4 = inlined_call_operand.vmem [shape: f32[40,1], index: 4, kind: input, shape index: {}]   ;;  %s964_s5 = inlined_call_operand.vmem [shape: s32[1,40], index: 5, kind: input, shape index: {}]   ;;  %s965_s6 = inlined_call_operand.vmem [shape: bf16[32,128], index: 6, kind: input, shape index: {}]   ;;  %s966_s7 = inlined_call_operand.vmem [shape: f32[1,128], index: 7, kind: input, shape index: {}]   ;;  %s967_s8 = inlined_call_operand.vmem [shape: f32[1,128], index: 8, kind: input, shape index: {}]   ;;  %s968_s9 = inlined_call_operand.vmem [shape: bf16[128,128], index: 9, kind: input, shape index: {}]   ;;  %s969_s10 = inlined_call_operand.vmem [shape: f32[1,128], index: 10, kind: input, shape index: {}]   ;;  %s970_s11 = inlined_call_operand.hbm [shape: f32[24,128], index: 11, kind: output, shape index: {}]  }
   0x1   :  { %17 = sst [smem:[#allocation5]] %s960_s1 }
   0x2   :  { %19 = vsyncpa [#allocation8], 0  ;;  %p90_p0 = scmp.lt.s32.totalorder %s959_s0, 0  ;;  %v763_v0 = vmov 0.0   ;;  %v724_v1 = vld [vmem:[%s965_s6] sm:$0xff]   ;;  %v725_v2 = vld [vmem:[%s965_s6 + $0x8] sm:$0xff]  }
   0x3   :  { %622 = vmatprep.subr.bf16.mxu0 %v763_v0  ;;  %397 = vst [vmem:[#allocation2] sm:$0xff] %v763_v0  ;;  %398 = vst [vmem:[#allocation2 + $0x8] sm:$0xff] %v763_v0  ;;  %691 = vmatprep.subr.bf16.mxu1 %v763_v0  ;;  %vm764_vm0 = vmmov 0   ;;  %s74_s29 = smul.u32 5, %s959_s0  ;;  %v765_v3 = vmov 0   ;;  %v729_v4 = vld [vmem:[%s968_s9] sm:$0xff]  }
   0x4   :  { %399 = vst [vmem:[#allocation2 + $0x10] sm:$0xff] %v763_v0  ;;  %s849_s24 = scalar_select %p90_p0, %s959_s0, 0  ;;  %626 = vmatprep.mubr.msk.bf16.mxu0 %vm764_vm0, %v763_v0  ;;  %658 = vmatprep.mubr.msk.bf16.mxu1 %vm764_vm0, %v763_v0  ;;  %v730_v5 = vld [vmem:[%s968_s9 + $0x8] sm:$0xff]   ;;  %vm173_vm1 = vcmask 261120   ;;  %v731_v6 = vld [vmem:[%s968_s9 + $0x10] sm:$0xff]   ;;  %v732_v11 = vld [vmem:[%s968_s9 + $0x18] sm:$0xff]  }
   0x5   :  { %623 = vmatpush3.bf16.msra.mxu0 %v724_v1  ;;  %723 = vset.pattern.permute.xlu1 %v765_v3  ;;  %p75_p1 = scmp.lt.s32.totalorder %s74_s29, 4  ;;  %v733_v15 = vld [vmem:[%s968_s9 + $0x20] sm:$0xff]   ;;  %v734_v17 = vld [vmem:[%s968_s9 + $0x28] sm:$0xff]   ;;  %v735_v18 = vld [vmem:[%s968_s9 + $0x30] sm:$0xff]   ;;  %p589_p2 = scmp.ne.s32.totalorder %s961_s2, 1 }
   0x6   :  { %s92_s14 = scalar_lea.vmem %s964_s5, %s849_s24  ;;  %624 = vmatprep.subr.bf16.mxu0 %v763_v0  ;;  %722 = vset.pattern.permute.xlu0 %v765_v3  ;;  %v736_v19 = vld [vmem:[%s968_s9 + $0x38] sm:$0xff]   ;;  %v570_v21 = vld [vmem:[%s966_s7] ss:$0 sm:$0xff]  ;;  %s933_s7 = sld [smem:[#allocation5]]  ;;  %vm767_vm2 = vmmov (!%p589_p2), 0   ;;  %vm429_vm3 = vcmask (!%p589_p2), 326656  }
   0x7   :  { %699 = vmatpush3.bf16.msra.mxu1 %v729_v4  ;;  %s972_s29 = smov (!%p75_p1, %s74_s29), 4  ;;  %v579_v27 = vld [vmem:[%s967_s8] ss:$0 sm:$0xff] }
   0x8   :  { %692 = vmatprep.subr.bf16.mxu1 %v763_v0  ;;  %s568_s16 = sshll.u32 %s972_s29, 2  ;;  %s569_s17 = sshll.u32 %s972_s29, 3  ;;  %v580_v62 = vld [vmem:[%s969_s10] ss:$0 sm:$0xff] }
   0x9   :  { %625 = vmatpush3.bf16.msra.mxu0 %v725_v2  ;;  %s877_s20 = scalar_lea.vmem %s962_s3, %s568_s16  ;;  %s86_s1 = scalar_lea.vmem %s963_s4, %s569_s17 }
   0xa   :  { %638 = vmatprep.subr.bf16.mxu0 %v763_v0  ;;  %v726_v7 = vld [vmem:[%s877_s20] sm:$0xff]   ;;  %v108_v8 = vld [vmem:[%s86_s1 + $0x10] sm:$0xff]  ;;  %v109_v10 = vld [vmem:[%s86_s1 + $0x18] sm:$0xff] }
   0xb   :  { %700 = vmatpush3.bf16.msra.mxu1 %v730_v5  ;;  %124 = vperm.xlu0 %722, %v108_v8   ;;  %v106_v9 = vld [vmem:[%s86_s1] sm:$0xff]  ;;  %v107_v12 = vld [vmem:[%s86_s1 + $0x8] sm:$0xff]  ;;  %v728_v16 = vld [vmem:[%s877_s20 + $0x10] ss:$0 sps:$4 sm:$0xff]  }
   0xc   :  { %693 = vmatprep.subr.bf16.mxu1 %v763_v0  ;;  %627 = vmatmul.mubr.msk.bf16.vlgmr.msra.gmra.mrb[0].mxu0 %vm173_vm1, %v726_v7  ;;  %v727_v13 = vld [vmem:[%s877_s20 + $0x8] sm:$0xff]   ;;  %v110_v14 = vld [vmem:[%s86_s1 + $0x20] sm:$0xff]  ;;  %s406_s21 = smul.u32 (!%p589_p2), 24, %s933_s7 }
   0xd   :  { %630 = vmatprep.mubr.msk.bf16.mxu0 %vm764_vm0, %v763_v0  ;;  %114 = vperm.xlu1 %723, %v106_v9  }
   0xe   :  { %639 = vmatpush3.bf16.msra.mxu0 %v729_v4 }
   0xf   :  { %701 = vmatpush3.bf16.msra.mxu1 %v731_v6  ;;  %640 = vmatprep.subr.bf16.mxu0 %v763_v0 }
  0x10   :  { %694 = vmatprep.subr.bf16.mxu1 %v763_v0  ;;  %129 = vperm.xlu0 %722, %v109_v10  }
  0x11   :  { %119 = vperm.xlu1 %723, %v107_v12  }
  0x12   :  { %641 = vmatpush3.bf16.msra.mxu0 %v730_v5 }
  0x13   :  { %702 = vmatpush3.bf16.msra.mxu1 %v732_v11  ;;  %642 = vmatprep.subr.bf16.mxu0 %v763_v0 }
  0x14   :  { %695 = vmatprep.subr.bf16.mxu1 %v763_v0  ;;  %631 = vmatmul.mubr.msk.bf16.gmra.mrb[4].mxu0 %vm173_vm1, %v727_v13 }
  0x15   :  { %634 = vmatprep.mubr.msk.bf16.mxu0 %vm764_vm0, %v763_v0  ;;  %134 = vperm.xlu0 %722, %v110_v14  }
  0x16   :  { %643 = vmatpush3.bf16.msra.mxu0 %v731_v6 }
  0x17   :  { %703 = vmatpush3.bf16.msra.mxu1 %v733_v15  ;;  %644 = vmatprep.subr.bf16.mxu0 %v763_v0 }
  0x18   :  { %696 = vmatprep.subr.bf16.mxu1 %v763_v0 }
  0x1a   :  { %645 = vmatpush3.bf16.msra.mxu0 %v732_v11 }
  0x1b   :  { %646 = vmatprep.subr.bf16.mxu0 %v763_v0  ;;  %704 = vmatpush3.bf16.msra.mxu1 %v734_v17 }
  0x1c   :  { %635 = vmatmul.mubr.msk.bf16.gmra.mrb[8].mxu0 %vm173_vm1, %v728_v16  ;;  %697 = vmatprep.subr.bf16.mxu1 %v763_v0 }
  0x1d   :  { %654 = vmatprep.mubr.msk.bf16.mxu0 %vm764_vm0, %v763_v0 }
  0x1e   :  { %647 = vmatpush3.bf16.msra.mxu0 %v733_v15 }
  0x1f   :  { %648 = vmatprep.subr.bf16.mxu0 %v763_v0  ;;  %705 = vmatpush3.bf16.msra.mxu1 %v735_v18 }
  0x20   :  { %698 = vmatprep.subr.bf16.mxu1 %v763_v0 }
  0x22   :  { %649 = vmatpush3.bf16.msra.mxu0 %v734_v17  ;;  %v405_v17 = vld [vmem:[%s92_s14] sm:$0x1] (!%p589_p2) }
  0x23   :  { %650 = vmatprep.subr.bf16.mxu0 %v763_v0  ;;  %706 = vmatpush3.bf16.msra.mxu1 %v736_v19 }
  0x26   :  { %651 = vmatpush3.bf16.msra.mxu0 %v735_v18  ;;  %v766_v18 = vmov (!%p589_p2), 0.0|0.0  }
  0x27   :  { %652 = vmatprep.subr.bf16.mxu0 %v763_v0  ;;  %707 = vmatprep.subr.bf16.mxu1 (!%p589_p2), %v766_v18 }
  0x2a   :  { %653 = vmatpush3.bf16.msra.mxu0 %v736_v19  ;;  %v409_v19 = vlaneseq (!%p589_p2) }
  0x2b   :  { %685 = vmatprep.subr.bf16.mxu0 (!%p589_p2), %v766_v18 }
  0x8a   :  { %v125_v25 = vpop.permute.xlu0 %124 }
  0x8b   :  { %v145_v36 = vmul.f32 %v570_v21, %v125_v25 }
  0x8c   :  { %v115_v20 = vpop.permute.xlu1 %114 }
  0x8d   :  { %v143_v23 = vmul.f32 %v570_v21, %v115_v20 }
  0x8f   :  { %v130_v35 = vpop.permute.xlu0 %129 }
  0x90   :  { %v120_v22 = vpop.permute.xlu1 %119  ;;  %v146_v40 = vmul.f32 %v570_v21, %v130_v35 }
  0x91   :  { %v144_v24 = vmul.f32 %v570_v21, %v120_v22 }
  0x94   :  { %v135_v48 = vpop.permute.xlu0 %134 }
  0x95   :  { %v147_v50 = vmul.f32 %v570_v21, %v135_v48  ;;  %v407_v21 = vstv (!%p589_p2), %s406_s21 }
  0x96   :  { %v408_v22 = vsub.s32 (!%p589_p2), %v405_v17, %v407_v21 }
  0xdf   :  { %v217_v26 = vpop.f32.mrb[0].mxu0 }
  0xe0   :  { %v218_v28 = vadd.f32 %v217_v26, %v143_v23  ;;  %v628_v29 = vpop.f32.mrb[1].mxu0  ;;  %v410_v23 = vshrl.u32 (!%p589_p2), %v409_v19, 7 }
  0xe1   :  { %v220_v30 = vpop.f32.mrb[2].mxu0 }
  0xe2   :  { %v246_v31 = vadd.f32 %v579_v27, %v218_v28  ;;  %v221_v32 = vadd.f32 %v220_v30, %v144_v24  ;;  %v629_v33 = vpop.f32.mrb[3].mxu0  ;;  %v768_v24 = vmov (!%p589_p2), 0.0   ;;  %v411_v25 = vadd.s32 (!%p589_p2), 8, %v410_v23 }
  0xe3   :  { %v415_v26 = vsub.s32 (!%p589_p2), 0, %v410_v23  ;;  %v426_v33 = vld [vmem:[#allocation2] sm:$0xff] (!%p589_p2) }
  0xe4   :  { %v247_v34 = vadd.f32 %v579_v27, %v221_v32  ;;  %v251_v37 = vmax.f32 %v246_v31, 0.0  ;;  %v427_v32 = vld [vmem:[#allocation2 + $0x8] sm:$0xff] (!%p589_p2) }
  0xe5   :  { %v416_v28 = vrot.slane (!%p589_p2), %v408_v22, %v415_v26 }
  0xe6   :  { %v252_v38 = vmax.f32 %v247_v34, 0.0 }
  0xe7   :  { %v225_v39 = vpop.f32.mrb[4].mxu0  ;;  %vm418_vm4 = vcmp.eq.s32.totalorder (!%p589_p2), %v411_v25, %v416_v28  ;;  %vm417_vm5 = vcmp.eq.s32.totalorder (!%p589_p2), %v410_v23, %v416_v28 }
  0xe8   :  { %v256_v41 = vpack.c.bf16 %v252_v38, %v251_v37  ;;  %v226_v42 = vadd.f32 %v225_v39, %v145_v36  ;;  %v632_v43 = vpop.f32.mrb[5].mxu0  ;;  %v591_v29 = vsel (!%p589_p2), %vm418_vm4, 1.0, %v768_v24  ;;  %v590_v30 = vsel (!%p589_p2), %vm417_vm5, 1.0, %v768_v24 }
  0xe9   :  { %v228_v44 = vpop.f32.mrb[6].mxu0 }
  0xea   :  { %v248_v45 = vadd.f32 %v579_v27, %v226_v42  ;;  %v229_v46 = vadd.f32 %v228_v44, %v146_v40  ;;  %v633_v47 = vpop.f32.mrb[7].mxu0  ;;  %655 = vmatmul.mubr.bf16.vlgmr.msra.gmra.mrb[12].mxu0 %v256_v41  ;;  %v428_v40 = vld [vmem:[#allocation2 + $0x10] sm:$0xff] (!%p589_p2) }
  0xeb   :  { %676 = vmatprep.mubr.msk.f32.mxu0 (!%p589_p2), %vm767_vm2, %v768_v24 }
  0xec   :  { %v249_v49 = vadd.f32 %v579_v27, %v229_v46  ;;  %v253_v51 = vmax.f32 %v248_v45, 0.0 }
  0xee   :  { %v254_v52 = vmax.f32 %v249_v49, 0.0 }
  0xef   :  { %v233_v53 = vpop.f32.mrb[8].mxu0 }
  0xf0   :  { %v234_v54 = vadd.f32 %v233_v53, %v147_v50  ;;  %v636_v55 = vpop.f32.mrb[9].mxu0  ;;  %v257_v56 = vpack.c.bf16 %v254_v52, %v253_v51 }
  0xf1   :  { %v236_v57 = vpop.f32.mrb[10].mxu0 }
  0xf2   :  { %v250_v58 = vadd.f32 %v579_v27, %v234_v54  ;;  %v637_v59 = vpop.f32.mrb[11].mxu0  ;;  %659 = vmatmul.mubr.bf16.vlgmr.msra.gmra.mrb[0].mxu1 %v257_v56  ;;  %v412_v27 = vadd.s32 (!%p589_p2), 16, %v410_v23 }
  0xf3   :  { %662 = vmatprep.mubr.msk.bf16.mxu1 %vm764_vm0, %v763_v0 }
  0xf4   :  { %v255_v60 = vmax.f32 %v250_v58, 0.0  ;;  %vm419_vm6 = vcmp.eq.s32.totalorder (!%p589_p2), %v412_v27, %v416_v28 }
  0xf5   :  { %v592_v31 = vsel (!%p589_p2), %vm419_vm6, 1.0, %v768_v24 }
  0xf6   :  { %v258_v61 = vpack.c.bf16 %v255_v60, %v255_v60 }
  0xfa   :  { %663 = vmatmul.mubr.bf16.gmra.mrb[4].mxu1 %v258_v61 }
  0xfb   :  { %679 = vmatprep.mubr.msk.f32.mxu1 (!%p589_p2), %vm767_vm2, %v768_v24 }
 0x1bd   :  { %v364_v63 = vpop.f32.mrb[12].mxu0 }
 0x1be   :  { %v365_v1 = vadd.f32 %v580_v62, %v364_v63  ;;  %v656_v2 = vpop.f32.mrb[13].mxu0 }
 0x1bf   :  { %v367_v3 = vpop.f32.mrb[14].mxu0 }
 0x1c0   :  { %v368_v4 = vadd.f32 %v580_v62, %v367_v3  ;;  %v657_v5 = vpop.f32.mrb[15].mxu0 }
 0x1c2   :  { %v686_v16 = vpack.c.bf16 (!%p589_p2), %v368_v4, %v365_v1 }
 0x1c4   :  { %710 = vmatpush3.bf16.msra.mxu1 (!%p589_p2), %v686_v16  ;;  %687 = vmatpush3.bf16.msra.mxu0 (!%p589_p2), %v686_v16 }
 0x1c5   :  { %v372_v6 = vpop.f32.mrb[0].mxu1  ;;  %708 = vmatprep.subr.bf16.mxu1 (!%p589_p2), %v766_v18  ;;  %688 = vmatprep.subr.bf16.mxu0 (!%p589_p2), %v766_v18 }
 0x1c6   :  { %v373_v7 = vadd.f32 %v580_v62, %v372_v6  ;;  %v660_v8 = vpop.f32.mrb[1].mxu1 }
 0x1c7   :  { %v375_v9 = vpop.f32.mrb[2].mxu1 }
 0x1c8   :  { %v376_v0 = vadd.f32 %v580_v62, %v375_v9  ;;  %v661_v10 = vpop.f32.mrb[3].mxu1 }
 0x1ca   :  { %404 = sbr.rel (%p589_p2) target bundleno = 684 (0x2ac), region = 41  ;;  %v689_v20 = vpack.c.bf16 (!%p589_p2), %v376_v0, %v373_v7 }
 0x1cc   :  { %711 = vmatpush3.bf16.msra.mxu1 (!%p589_p2), %v689_v20  ;;  %690 = vmatpush3.bf16.msra.mxu0 (!%p589_p2), %v689_v20 }
 0x1cd   :  { %v380_v11 = vpop.f32.mrb[4].mxu1  ;;  %709 = vmatprep.subr.mxu1 (!%p589_p2), %v768_v24  ;;  %674 = vmatprep.subr.mxu0 (!%p589_p2), %v768_v24 }
 0x1ce   :  { %v381_v12 = vadd.f32 %v580_v62, %v380_v11  ;;  %v664_v13 = vpop.f32.mrb[5].mxu1 }
 0x1cf   :  { %v383_v14 = vpop.f32.mrb[6].mxu1 }
 0x1d0   :  { %v665_v15 = vpop.f32.mrb[7].mxu1  ;;  %712 = vmatpush3.msra.mxu1 (!%p589_p2), %v381_v12  ;;  %675 = vmatpush3.msra.mxu0 (!%p589_p2), %v381_v12 }
 0x1d1   :  { %680 = vmatmul.mubr.msk.f32.vlgmr.msra.gmra.mrb[0].mxu1 %vm429_vm3, %v591_v29  ;;  %677 = vmatmul.mubr.msk.f32.vlgmr.msra.gmra.mrb[0].mxu0 %vm429_vm3, %v590_v30 }
 0x1d2   :  { %682 = vmatprep.mubr.msk.f32.mxu1 %vm767_vm2, %v768_v24 }
 0x1d5   :  { %683 = vmatmul.mubr.msk.f32.gmra.mrb[2].mxu1 %vm429_vm3, %v592_v31 }
 0x2a4   :  { %v510_v34 = vpop.f32.mrb[0].mxu1  ;;  %v505_v35 = vpop.f32.mrb[0].mxu0 }
 0x2a5   :  { %v520_v36 = vadd.f32 %v510_v34, %v427_v32  ;;  %v681_v37 = vpop.f32.mrb[1].mxu1  ;;  %v519_v38 = vadd.f32 %v505_v35, %v426_v33  ;;  %v678_v39 = vpop.f32.mrb[1].mxu0 }
 0x2a7   :  { %523 = vst [vmem:[#allocation2 + $0x8] sm:$0xff] %v520_v36  ;;  %522 = vst [vmem:[#allocation2] sm:$0xff] %v519_v38 }
 0x2a8   :  { %v515_v41 = vpop.f32.mrb[2].mxu1 }
 0x2a9   :  { %v521_v42 = vadd.f32 %v515_v41, %v428_v40  ;;  %v684_v43 = vpop.f32.mrb[3].mxu1 }
 0x2ab   :  { %524 = vst [vmem:[#allocation2 + $0x10] sm:$0xff] %v521_v42 }
 0x2ac PF:  { %s533_s2 = sld [smem:[#allocation5]]  ;;  %s769_s5 = smov [#allocation7]  }
 0x2ad   :  { %s540_s24 = sshll.u32 %s769_s5, 4  ;;  %s541_s24 = int_to_ptr.vmem [resolvable:$true] %s540_s24 }
 0x2ae   :  { %v525_v44 = vld [vmem:[#allocation2] sm:$0xff]  ;;  %v526_v45 = vld [vmem:[#allocation2 + $0x8] sm:$0xff]  ;;  %s737_s25 = scalar_lea.vmem %s541_s24, 384  ;;  %p742_p4 = scmp.lt.s32.totalorder %s541_s24, %s541_s24 }
 0x2af   :  { %528 = vst [vmem:[#allocation7] sm:$0xff] %v525_v44  ;;  %529 = vst [vmem:[#allocation7 + $0x8] sm:$0xff] %v526_v45  ;;  %p738_p3 = scmp.ne.s32.totalorder %s541_s24, %s737_s25  ;;  %p743_p5 = scmp.lt.s32.totalorder %s737_s25, %s737_s25 }
 0x2b1   :  { %p744_p6 = por %p743_p5, %p742_p4 }
 0x2b2   :  { %v527_v46 = vld [vmem:[#allocation2 + $0x10] sm:$0xff]  ;;  %s597_s14 = smul.u32 384, %s533_s2 }
 0x2b3   :  { %530 = vst [vmem:[#allocation7 + $0x10] sm:$0xff] %v527_v46  ;;  %p745_p7 = pnand %p744_p6, %p738_p3 }
 0x2b4   :  { %s539_s23 = scalar_lea.hbm %s970_s11, %s597_s14 }
 0x2b5   :  { %748 = shalt.err (!%p745_p7)
}
 0x2b6   :  { %s749_s3 = scalar_lea.hbm %s539_s23, 384  ;;  %s751_s27 = scalar_lea.hbm %s970_s11, 384 }
 0x2b7   :  { %p750_p8 = scmp.ne.s32.totalorder %s539_s23, %s749_s3  ;;  %p752_p9 = scmp.lt.u32.totalorder %s539_s23, %s970_s11 }
 0x2b8   :  { %p753_p10 = scmp.lt.u32.totalorder %s751_s27, %s749_s3  ;;  %p755_p12 = scmp.lt.u32.totalorder %s749_s3, %s539_s23 }
 0x2ba   :  { %p754_p11 = por %p753_p10, %p752_p9 }
 0x2bc   :  { %p756_p13 = por %p755_p12, %p754_p11 }
 0x2be   :  { %p757_p0 = pnand %p756_p13, %p750_p8 }
 0x2c0   :  { %760 = shalt.err (!%p757_p0)
}
 0x2c1   :  { %s770_s30 = smov 128   ;;  %s771_s12 = smov 8  }
 0x2c2   :  { %546 = dma.vmem_to_hbm [thread:$0]  %s541_s24, 384, %s539_s23, [#allocation8], %s770_s30, %s770_s30, %s771_s12  }
 0x2c3   :  { %761 = dma.done.wait [#allocation8], 384  }
 0x2c4   :  { %762 = vsyncadd [#allocation8], 4294966912 }
 0x2c5   :  { %550 = vsyncpa [#allocation8], 1 }

</bundles_post_ra>
